<compile_context>
chip_gen: v6e
topology: v6e:2x2x1
jax: 0.10.0
libtpu: 0.0.40
codegen_flags: <defaults>
</compile_context>

<pallas_src>
import jax
import jax.numpy as jnp
from jax.experimental import pallas as pl
from jax.experimental.pallas import tpu as pltpu

_LANES = 128
_MAX_TILE_ROWS = 1024   # 512 KiB per f32 input block; 2-3 streams x 2 buffers fits
                        # the scoped-VMEM defaults on v5e/v6e/v7x.
_SPLIT = 2              # leading "parallel" grid axis -> both TensorCores on v7x.


def _round_up(x, m):
    return (x + m - 1) // m * m


def _build_kernel(tile_rows, steps, n_valid, needs_mask, has_weight):
    n_fold = tile_rows // 8

    def kernel(*refs):
        if has_weight:
            lg_ref, tg_ref, w_ref, out_ref = refs[:4]
        else:
            lg_ref, tg_ref, out_ref = refs[:3]
            w_ref = None
        bce_acc, ppos_acc, p2_acc, t2_acc, pos_acc = refs[-5:]

        c = pl.program_id(0)   # parallel split
        i = pl.program_id(1)   # reduction step within the split

        @pl.when(i == 0)
        def _():
            bce_acc[...] = jnp.zeros_like(bce_acc)
            ppos_acc[...] = jnp.zeros_like(ppos_acc)
            p2_acc[...] = jnp.zeros_like(p2_acc)
            t2_acc[...] = jnp.zeros_like(t2_acc)
            pos_acc[...] = jnp.zeros_like(pos_acc)

        x = lg_ref[...].astype(jnp.float32)
        t = tg_ref[...].astype(jnp.float32)

        # Fused numerically-stable BCE-with-logits + sigmoid: one exp per element.
        #   softplus(-|x|) = log1p(e),  sigmoid(x) = where(x>=0, 1, e) / (1 + e)
        # (exact divide kept; approx reciprocal rejected for tolerance reasons)
        e = jnp.exp(-jnp.abs(x))
        softplus = jnp.log1p(e)
        p = jnp.where(x >= 0.0, 1.0, e) / (1.0 + e)

        bce = jnp.maximum(x, 0.0) - x * t + softplus
        if has_weight:
            bce = bce * w_ref[...].astype(jnp.float32)
        pos = (t > 0.5).astype(jnp.float32)

        if needs_mask:
            row0 = (c * steps + i) * tile_rows
            sub = jax.lax.broadcasted_iota(jnp.int32, (tile_rows, _LANES), 0)
            lane = jax.lax.broadcasted_iota(jnp.int32, (tile_rows, _LANES), 1)
            gidx = (row0 + sub) * _LANES + lane
            valid = (gidx < n_valid).astype(jnp.float32)
            bce = bce * valid
            pos = pos * valid
            p2 = p * p * valid
            t2 = t * t * valid
        else:
            p2 = p * p
            t2 = t * t

        def fold(v):
            # reduce (tile_rows, 128) -> one vreg (8, 128) before accumulating,
            # keeping accumulator load/store traffic at 5 vregs per block.
            return v.reshape(n_fold, 8, _LANES).sum(axis=0)

        bce_acc[...] += fold(bce)           # sum of (weighted) elementwise BCE
        ppos_acc[...] += fold(p * pos)      # sum of p where targets > 0.5
        p2_acc[...] += fold(p2)             # sum(p**2)
        t2_acc[...] += fold(t2)             # sum(targets**2)
        pos_acc[...] += fold(pos)           # count of targets > 0.5

        @pl.when(i == pl.num_programs(1) - 1)
        def _():
            sums = jnp.stack([
                jnp.sum(bce_acc[...]),
                jnp.sum(ppos_acc[...]),
                jnp.sum(p2_acc[...]),
                jnp.sum(t2_acc[...]),
                jnp.sum(pos_acc[...]),
                0.0, 0.0, 0.0,
            ])
            out_ref[...] = jnp.broadcast_to(sums[None, :, None], (1, 8, _LANES))

    return kernel


def mincut_loss(logits, targets, weight=None, eps=1e-3,
                w_ce=0.2, w_dice=0.8, w_mc=1.0):
    """Pallas implementation of MincutLoss.forward (scalar f32 result)."""
    n = int(logits.size)
    rows = _round_up(n, _LANES) // _LANES
    rows_per_split = _round_up(rows, _SPLIT) // _SPLIT
    tile_rows = min(_MAX_TILE_ROWS, _round_up(rows_per_split, 8))
    steps = _round_up(rows_per_split, tile_rows) // tile_rows
    padded_rows = _SPLIT * steps * tile_rows
    pad = padded_rows * _LANES - n
    needs_mask = pad > 0

    def prep(a):
        flat = a.reshape(-1)                 # keep source dtype; cast in-kernel
        if pad:
            flat = jnp.pad(flat, (0, pad))
        return flat.reshape(padded_rows, _LANES)

    operands = [prep(logits), prep(targets)]
    has_weight = weight is not None
    if has_weight:
        # TODO(synk): scalar / per-channel weights could be fed via SMEM scalar
        # prefetch instead of a full broadcast HBM stream.
        operands.append(prep(jnp.broadcast_to(weight, logits.shape)))

    blk = pl.BlockSpec((tile_rows, _LANES), lambda c, i: (c * steps + i, 0))

    kernel = _build_kernel(tile_rows, steps, n, needs_mask, has_weight)

    partials = pl.pallas_call(
        kernel,
        out_shape=jax.ShapeDtypeStruct((_SPLIT, 8, _LANES), jnp.float32),
        grid_spec=pltpu.PrefetchScalarGridSpec(
            num_scalar_prefetch=0,
            grid=(_SPLIT, steps),
            in_specs=[blk] * len(operands),
            out_specs=pl.BlockSpec((1, 8, _LANES), lambda c, i: (c, 0, 0)),
            scratch_shapes=[pltpu.VMEM((8, _LANES), jnp.float32)] * 5,
        ),
        compiler_params=pltpu.CompilerParams(
            dimension_semantics=("parallel", "arbitrary")),
    )(*operands)

    s = jnp.sum(partials, axis=0)[:, 0]      # combine the per-core partial slabs
    bce = s[0] / n                           # mean over all elements (torch semantics)
    num = 2.0 * s[1]
    denom = s[2] + s[3]
    dice = jnp.clip((num + eps) / (denom + eps), eps, 1.0 - eps)
    dice_loss = -jnp.log(dice)
    mincut = s[4] - s[1]                     # sum_{t>0.5}(1 - p) = count_pos - sum p
    # TODO(synk): the torch module also prints 'CE/Dice/Mincut' each call; side-effect omitted.
    return w_ce * bce + w_dice * dice_loss + w_mc * mincut


def _reference(logits, targets, weight=None, eps=1e-3,
               w_ce=0.2, w_dice=0.8, w_mc=1.0):
    x = logits.astype(jnp.float32)
    t = targets.astype(jnp.float32)
    bce_el = jnp.maximum(x, 0.0) - x * t + jnp.log1p(jnp.exp(-jnp.abs(x)))
    if weight is not None:
        bce_el = bce_el * jnp.broadcast_to(weight, x.shape).astype(jnp.float32)
    bce = bce_el.mean()
    p = jax.nn.sigmoid(x)
    pos = t > 0.5
    num = 2.0 * jnp.sum(jnp.where(pos, p, 0.0))
    denom = jnp.sum(p * p) + jnp.sum(t * t)
    dice = jnp.clip((num + eps) / (denom + eps), eps, 1.0 - eps)
    dice_loss = -jnp.log(dice)
    mincut = jnp.sum(jnp.where(pos, 1.0 - p, 0.0))
    return w_ce * bce + w_dice * dice_loss + w_mc * mincut


if __name__ == "__main__":
    key = jax.random.PRNGKey(0)
    k1, k2, k3, k4, k5 = jax.random.split(key, 5)

    # NCHW segmentation logits implied by the module's forward
    logits = jax.random.normal(k1, (2, 4, 16, 16), dtype=jnp.float32)
    targets = jax.random.bernoulli(k2, 0.5, (2, 4, 16, 16)).astype(jnp.float32)

    out = jax.block_until_ready(mincut_loss(logits, targets))
    ref = _reference(logits, targets)
    assert jnp.allclose(out, ref, rtol=1e-4, atol=1e-4), (out, ref)

    # odd-sized, weighted input exercises the masked-tail and weighted paths
    lg2 = jax.random.normal(k3, (2, 3, 15, 17), dtype=jnp.float32)
    tg2 = jax.random.bernoulli(k4, 0.4, (2, 3, 15, 17)).astype(jnp.float32)
    wt2 = jax.random.uniform(k5, (2, 3, 15, 17), dtype=jnp.float32)
    out2 = jax.block_until_ready(mincut_loss(lg2, tg2, weight=wt2))
    ref2 = _reference(lg2, tg2, weight=wt2)
    assert jnp.allclose(out2, ref2, rtol=1e-4, atol=1e-4), (out2, ref2)

    print("KERNEL_OK")
</pallas_src>

<mosaic_0001>
module attributes {stable_mosaic.version = 11 : i64} {
  func.func @kernel(%arg0: i32, %arg1: i32, %arg2: memref<8x128xf32, #tpu.memory_space<vmem>>, %arg3: memref<8x128xf32, #tpu.memory_space<vmem>>, %arg4: memref<1x8x128xf32, #tpu.memory_space<vmem>>, %arg5: memref<8x128xf32, #tpu.memory_space<vmem>>, %arg6: memref<8x128xf32, #tpu.memory_space<vmem>>, %arg7: memref<8x128xf32, #tpu.memory_space<vmem>>, %arg8: memref<8x128xf32, #tpu.memory_space<vmem>>, %arg9: memref<8x128xf32, #tpu.memory_space<vmem>>) attributes {dimension_semantics = [#tpu.dimension_semantics<parallel>, #tpu.dimension_semantics<arbitrary>], iteration_bounds = array<i64: 2, 1>, scalar_prefetch = 0 : i64, scratch_operands = 5 : i64, tpu.core_type = #tpu.core_type<tc>, window_params = [{transform_indices = @transform_0, window_bounds = array<i64: 8, 128>}, {transform_indices = @transform_1, window_bounds = array<i64: 8, 128>}, {transform_indices = @transform_2, window_bounds = array<i64: 1, 8, 128>}]} {
    %c0_i32 = arith.constant 0 : i32
    %0 = arith.cmpi eq, %arg1, %c0_i32 : i32
    %1 = arith.extui %0 : i1 to i32
    %c0_i32_0 = arith.constant 0 : i32
    %2 = arith.cmpi ne, %1, %c0_i32_0 : i32
    scf.if %2 {
      %cst_36 = arith.constant 0.000000e+00 : f32
      %57 = vector.broadcast %cst_36 : f32 to vector<8x128xf32>
      %c0_37 = arith.constant 0 : index
      %c0_38 = arith.constant 0 : index
      %58 = vector.load %arg5[%c0_37, %c0_38] : memref<8x128xf32, #tpu.memory_space<vmem>>, vector<8x128xf32>
      tpu.vector_store %arg5[%c0_37, %c0_38], %57 {strides = array<i32>} : memref<8x128xf32, #tpu.memory_space<vmem>>, vector<8x128xf32>,
      %cst_39 = arith.constant 0.000000e+00 : f32
      %59 = vector.broadcast %cst_39 : f32 to vector<8x128xf32>
      %c0_40 = arith.constant 0 : index
      %c0_41 = arith.constant 0 : index
      %60 = vector.load %arg6[%c0_40, %c0_41] : memref<8x128xf32, #tpu.memory_space<vmem>>, vector<8x128xf32>
      tpu.vector_store %arg6[%c0_40, %c0_41], %59 {strides = array<i32>} : memref<8x128xf32, #tpu.memory_space<vmem>>, vector<8x128xf32>,
      %cst_42 = arith.constant 0.000000e+00 : f32
      %61 = vector.broadcast %cst_42 : f32 to vector<8x128xf32>
      %c0_43 = arith.constant 0 : index
      %c0_44 = arith.constant 0 : index
      %62 = vector.load %arg7[%c0_43, %c0_44] : memref<8x128xf32, #tpu.memory_space<vmem>>, vector<8x128xf32>
      tpu.vector_store %arg7[%c0_43, %c0_44], %61 {strides = array<i32>} : memref<8x128xf32, #tpu.memory_space<vmem>>, vector<8x128xf32>,
      %cst_45 = arith.constant 0.000000e+00 : f32
      %63 = vector.broadcast %cst_45 : f32 to vector<8x128xf32>
      %c0_46 = arith.constant 0 : index
      %c0_47 = arith.constant 0 : index
      %64 = vector.load %arg8[%c0_46, %c0_47] : memref<8x128xf32, #tpu.memory_space<vmem>>, vector<8x128xf32>
      tpu.vector_store %arg8[%c0_46, %c0_47], %63 {strides = array<i32>} : memref<8x128xf32, #tpu.memory_space<vmem>>, vector<8x128xf32>,
      %cst_48 = arith.constant 0.000000e+00 : f32
      %65 = vector.broadcast %cst_48 : f32 to vector<8x128xf32>
      %c0_49 = arith.constant 0 : index
      %c0_50 = arith.constant 0 : index
      %66 = vector.load %arg9[%c0_49, %c0_50] : memref<8x128xf32, #tpu.memory_space<vmem>>, vector<8x128xf32>
      tpu.vector_store %arg9[%c0_49, %c0_50], %65 {strides = array<i32>} : memref<8x128xf32, #tpu.memory_space<vmem>>, vector<8x128xf32>,
    } else {
    }
    %c0 = arith.constant 0 : index
    %c0_1 = arith.constant 0 : index
    %3 = vector.load %arg2[%c0, %c0_1] : memref<8x128xf32, #tpu.memory_space<vmem>>, vector<8x128xf32>
    %c0_2 = arith.constant 0 : index
    %c0_3 = arith.constant 0 : index
    %4 = vector.load %arg3[%c0_2, %c0_3] : memref<8x128xf32, #tpu.memory_space<vmem>>, vector<8x128xf32>
    %5 = math.absf %3 : vector<8x128xf32>
    %cst = arith.constant 0.000000e+00 : f32
    %6 = vector.broadcast %cst : f32 to vector<8x128xf32>
    %7 = arith.subf %6, %5 : vector<8x128xf32>
    %8 = math.exp %7 : vector<8x128xf32>
    %9 = math.log1p %8 : vector<8x128xf32>
    %cst_4 = arith.constant 0.000000e+00 : f32
    %10 = vector.broadcast %cst_4 : f32 to vector<8x128xf32>
    %11 = arith.cmpf oge, %3, %10 : vector<8x128xf32>
    %cst_5 = arith.constant 1.000000e+00 : f32
    %12 = vector.broadcast %cst_5 : f32 to vector<8x128xf32>
    %13 = arith.select %11, %12, %8 : vector<8x128xi1>, vector<8x128xf32>
    %cst_6 = arith.constant 1.000000e+00 : f32
    %14 = vector.broadcast %cst_6 : f32 to vector<8x128xf32>
    %15 = arith.addf %14, %8 : vector<8x128xf32>
    %16 = arith.divf %13, %15 : vector<8x128xf32>
    %cst_7 = arith.constant 0.000000e+00 : f32
    %17 = vector.broadcast %cst_7 : f32 to vector<8x128xf32>
    %18 = arith.maximumf %3, %17 : vector<8x128xf32>
    %19 = arith.mulf %3, %4 : vector<8x128xf32>
    %20 = arith.subf %18, %19 : vector<8x128xf32>
    %21 = arith.addf %20, %9 : vector<8x128xf32>
    %cst_8 = arith.constant 5.000000e-01 : f32
    %22 = vector.broadcast %cst_8 : f32 to vector<8x128xf32>
    %23 = arith.cmpf ogt, %4, %22 : vector<8x128xf32>
    %24 = arith.extui %23 : vector<8x128xi1> to vector<8x128xi32>
    %25 = arith.sitofp %24 : vector<8x128xi32> to vector<8x128xf32>
    %26 = arith.mulf %16, %16 : vector<8x128xf32>
    %27 = arith.mulf %4, %4 : vector<8x128xf32>
    %c0_9 = arith.constant 0 : index
    %c0_10 = arith.constant 0 : index
    %28 = vector.load %arg5[%c0_9, %c0_10] : memref<8x128xf32, #tpu.memory_space<vmem>>, vector<8x128xf32>
    %29 = vector.shape_cast %21 : vector<8x128xf32> to vector<1x8x128xf32>
    %cst_11 = arith.constant dense<0.000000e+00> : vector<8x128xf32>
    %30 = vector.multi_reduction <add>, %29, %cst_11 [0] : vector<1x8x128xf32> to vector<8x128xf32>
    %31 = arith.addf %28, %30 : vector<8x128xf32>
    %c0_12 = arith.constant 0 : index
    %c0_13 = arith.constant 0 : index
    %32 = vector.load %arg5[%c0_12, %c0_13] : memref<8x128xf32, #tpu.memory_space<vmem>>, vector<8x128xf32>
    tpu.vector_store %arg5[%c0_12, %c0_13], %31 {strides = array<i32>} : memref<8x128xf32, #tpu.memory_space<vmem>>, vector<8x128xf32>,
    %c0_14 = arith.constant 0 : index
    %c0_15 = arith.constant 0 : index
    %33 = vector.load %arg6[%c0_14, %c0_15] : memref<8x128xf32, #tpu.memory_space<vmem>>, vector<8x128xf32>
    %34 = arith.mulf %16, %25 : vector<8x128xf32>
    %35 = vector.shape_cast %34 : vector<8x128xf32> to vector<1x8x128xf32>
    %cst_16 = arith.constant dense<0.000000e+00> : vector<8x128xf32>
    %36 = vector.multi_reduction <add>, %35, %cst_16 [0] : vector<1x8x128xf32> to vector<8x128xf32>
    %37 = arith.addf %33, %36 : vector<8x128xf32>
    %c0_17 = arith.constant 0 : index
    %c0_18 = arith.constant 0 : index
    %38 = vector.load %arg6[%c0_17, %c0_18] : memref<8x128xf32, #tpu.memory_space<vmem>>, vector<8x128xf32>
    tpu.vector_store %arg6[%c0_17, %c0_18], %37 {strides = array<i32>} : memref<8x128xf32, #tpu.memory_space<vmem>>, vector<8x128xf32>,
    %c0_19 = arith.constant 0 : index
    %c0_20 = arith.constant 0 : index
    %39 = vector.load %arg7[%c0_19, %c0_20] : memref<8x128xf32, #tpu.memory_space<vmem>>, vector<8x128xf32>
    %40 = vector.shape_cast %26 : vector<8x128xf32> to vector<1x8x128xf32>
    %cst_21 = arith.constant dense<0.000000e+00> : vector<8x128xf32>
    %41 = vector.multi_reduction <add>, %40, %cst_21 [0] : vector<1x8x128xf32> to vector<8x128xf32>
    %42 = arith.addf %39, %41 : vector<8x128xf32>
    %c0_22 = arith.constant 0 : index
    %c0_23 = arith.constant 0 : index
    %43 = vector.load %arg7[%c0_22, %c0_23] : memref<8x128xf32, #tpu.memory_space<vmem>>, vector<8x128xf32>
    tpu.vector_store %arg7[%c0_22, %c0_23], %42 {strides = array<i32>} : memref<8x128xf32, #tpu.memory_space<vmem>>, vector<8x128xf32>,
    %c0_24 = arith.constant 0 : index
    %c0_25 = arith.constant 0 : index
    %44 = vector.load %arg8[%c0_24, %c0_25] : memref<8x128xf32, #tpu.memory_space<vmem>>, vector<8x128xf32>
    %45 = vector.shape_cast %27 : vector<8x128xf32> to vector<1x8x128xf32>
    %cst_26 = arith.constant dense<0.000000e+00> : vector<8x128xf32>
    %46 = vector.multi_reduction <add>, %45, %cst_26 [0] : vector<1x8x128xf32> to vector<8x128xf32>
    %47 = arith.addf %44, %46 : vector<8x128xf32>
    %c0_27 = arith.constant 0 : index
    %c0_28 = arith.constant 0 : index
    %48 = vector.load %arg8[%c0_27, %c0_28] : memref<8x128xf32, #tpu.memory_space<vmem>>, vector<8x128xf32>
    tpu.vector_store %arg8[%c0_27, %c0_28], %47 {strides = array<i32>} : memref<8x128xf32, #tpu.memory_space<vmem>>, vector<8x128xf32>,
    %c0_29 = arith.constant 0 : index
    %c0_30 = arith.constant 0 : index
    %49 = vector.load %arg9[%c0_29, %c0_30] : memref<8x128xf32, #tpu.memory_space<vmem>>, vector<8x128xf32>
    %50 = vector.shape_cast %25 : vector<8x128xf32> to vector<1x8x128xf32>
    %cst_31 = arith.constant dense<0.000000e+00> : vector<8x128xf32>
    %51 = vector.multi_reduction <add>, %50, %cst_31 [0] : vector<1x8x128xf32> to vector<8x128xf32>
    %52 = arith.addf %49, %51 : vector<8x128xf32>
    %c0_32 = arith.constant 0 : index
    %c0_33 = arith.constant 0 : index
    %53 = vector.load %arg9[%c0_32, %c0_33] : memref<8x128xf32, #tpu.memory_space<vmem>>, vector<8x128xf32>
    tpu.vector_store %arg9[%c0_32, %c0_33], %52 {strides = array<i32>} : memref<8x128xf32, #tpu.memory_space<vmem>>, vector<8x128xf32>,
    %c0_i32_34 = arith.constant 0 : i32
    %54 = arith.cmpi eq, %arg1, %c0_i32_34 : i32
    %55 = arith.extui %54 : i1 to i32
    %c0_i32_35 = arith.constant 0 : i32
    %56 = arith.cmpi ne, %55, %c0_i32_35 : i32
    scf.if %56 {
      %c0_36 = arith.constant 0 : index
      %c0_37 = arith.constant 0 : index
      %57 = vector.load %arg5[%c0_36, %c0_37] : memref<8x128xf32, #tpu.memory_space<vmem>>, vector<8x128xf32>
      %58 = vector.shape_cast %57 : vector<8x128xf32> to vector<1x8x128xf32>
      %cst_38 = arith.constant dense<0.000000e+00> : vector<1xf32>
      %59 = vector.multi_reduction <add>, %58, %cst_38 [1, 2] : vector<1x8x128xf32> to vector<1xf32>
      %60 = vector.shape_cast %59 : vector<1xf32> to vector<1x1x1xf32>
      %61 = vector.extract %60[0, 0, 0] : f32 from vector<1x1x1xf32>
      %c0_39 = arith.constant 0 : index
      %c0_40 = arith.constant 0 : index
      %62 = vector.load %arg6[%c0_39, %c0_40] : memref<8x128xf32, #tpu.memory_space<vmem>>, vector<8x128xf32>
      %63 = vector.shape_cast %62 : vector<8x128xf32> to vector<1x8x128xf32>
      %cst_41 = arith.constant dense<0.000000e+00> : vector<1xf32>
      %64 = vector.multi_reduction <add>, %63, %cst_41 [1, 2] : vector<1x8x128xf32> to vector<1xf32>
      %65 = vector.shape_cast %64 : vector<1xf32> to vector<1x1x1xf32>
      %66 = vector.extract %65[0, 0, 0] : f32 from vector<1x1x1xf32>
      %c0_42 = arith.constant 0 : index
      %c0_43 = arith.constant 0 : index
      %67 = vector.load %arg7[%c0_42, %c0_43] : memref<8x128xf32, #tpu.memory_space<vmem>>, vector<8x128xf32>
      %68 = vector.shape_cast %67 : vector<8x128xf32> to vector<1x8x128xf32>
      %cst_44 = arith.constant dense<0.000000e+00> : vector<1xf32>
      %69 = vector.multi_reduction <add>, %68, %cst_44 [1, 2] : vector<1x8x128xf32> to vector<1xf32>
      %70 = vector.shape_cast %69 : vector<1xf32> to vector<1x1x1xf32>
      %71 = vector.extract %70[0, 0, 0] : f32 from vector<1x1x1xf32>
      %c0_45 = arith.constant 0 : index
      %c0_46 = arith.constant 0 : index
      %72 = vector.load %arg8[%c0_45, %c0_46] : memref<8x128xf32, #tpu.memory_space<vmem>>, vector<8x128xf32>
      %73 = vector.shape_cast %72 : vector<8x128xf32> to vector<1x8x128xf32>
      %cst_47 = arith.constant dense<0.000000e+00> : vector<1xf32>
      %74 = vector.multi_reduction <add>, %73, %cst_47 [1, 2] : vector<1x8x128xf32> to vector<1xf32>
      %75 = vector.shape_cast %74 : vector<1xf32> to vector<1x1x1xf32>
      %76 = vector.extract %75[0, 0, 0] : f32 from vector<1x1x1xf32>
      %c0_48 = arith.constant 0 : index
      %c0_49 = arith.constant 0 : index
      %77 = vector.load %arg9[%c0_48, %c0_49] : memref<8x128xf32, #tpu.memory_space<vmem>>, vector<8x128xf32>
      %78 = vector.shape_cast %77 : vector<8x128xf32> to vector<1x8x128xf32>
      %cst_50 = arith.constant dense<0.000000e+00> : vector<1xf32>
      %79 = vector.multi_reduction <add>, %78, %cst_50 [1, 2] : vector<1x8x128xf32> to vector<1xf32>
      %80 = vector.shape_cast %79 : vector<1xf32> to vector<1x1x1xf32>
      %81 = vector.extract %80[0, 0, 0] : f32 from vector<1x1x1xf32>
      %82 = vector.broadcast %61 : f32 to vector<1xf32>
      %83 = vector.broadcast %66 : f32 to vector<1xf32>
      %84 = vector.broadcast %71 : f32 to vector<1xf32>
      %85 = vector.broadcast %76 : f32 to vector<1xf32>
      %86 = vector.broadcast %81 : f32 to vector<1xf32>
      %cst_51 = arith.constant 0.000000e+00 : f32
      %87 = vector.broadcast %cst_51 : f32 to vector<1xf32>
      %cst_52 = arith.constant 0.000000e+00 : f32
      %88 = vector.broadcast %cst_52 : f32 to vector<1xf32>
      %cst_53 = arith.constant 0.000000e+00 : f32
      %89 = vector.broadcast %cst_53 : f32 to vector<1xf32>
      %90 = tpu.concatenate %82, %83, %84, %85, %86, %87, %88, %89 in 0 : vector<1xf32>, vector<1xf32>, vector<1xf32>, vector<1xf32>, vector<1xf32>, vector<1xf32>, vector<1xf32>, vector<1xf32> -> vector<8xf32>
      %91 = vector.shape_cast %90 : vector<8xf32> to vector<1x8x1xf32>
      %92 = vector.shape_cast %91 : vector<1x8x1xf32> to vector<1x8x1xf32>
      %93 = vector.broadcast %92 : vector<1x8x1xf32> to vector<1x8x128xf32>
      %c0_54 = arith.constant 0 : index
      %c0_55 = arith.constant 0 : index
      %c0_56 = arith.constant 0 : index
      %94 = vector.load %arg4[%c0_54, %c0_55, %c0_56] : memref<1x8x128xf32, #tpu.memory_space<vmem>>, vector<1x8x128xf32>
      tpu.vector_store %arg4[%c0_54, %c0_55, %c0_56], %93 {strides = array<i32>} : memref<1x8x128xf32, #tpu.memory_space<vmem>>, vector<1x8x128xf32>,
    } else {
    }
    return
  }
  func.func @transform_0(%arg0: i32, %arg1: i32) -> (i32, i32) {
    %c1_i32 = arith.constant 1 : i32
    %0 = arith.muli %arg0, %c1_i32 : i32
    %1 = arith.addi %0, %arg1 : i32
    %c0_i32 = arith.constant 0 : i32
    %c0_i32_0 = arith.constant 0 : i32
    return %1, %c0_i32 : i32, i32
  }
  func.func @transform_1(%arg0: i32, %arg1: i32) -> (i32, i32) {
    %c1_i32 = arith.constant 1 : i32
    %0 = arith.muli %arg0, %c1_i32 : i32
    %1 = arith.addi %0, %arg1 : i32
    %c0_i32 = arith.constant 0 : i32
    %c0_i32_0 = arith.constant 0 : i32
    return %1, %c0_i32 : i32, i32
  }
  func.func @transform_2(%arg0: i32, %arg1: i32) -> (i32, i32, i32) {
    %c0_i32 = arith.constant 0 : i32
    %c0_i32_0 = arith.constant 0 : i32
    %c0_i32_1 = arith.constant 0 : i32
    return %arg0, %c0_i32, %c0_i32_0 : i32, i32, i32
  }
}

</mosaic_0001>

<bundles_post_ra>
// kernel: tpu_custom_call.1
= control target key start
LH: loop header
LB: loop body
LE: loop exit
PB: predicated region body
PF: predicated region fallthrough
CT: control target
= control target key end

     0   :  { %7 = vsyncpa [#allocation8], 0  ;;  %s915_s0 = inlined_call_operand.hbm [shape: f32[16,128], index: 0, kind: input, shape index: {}]   ;;  %s916_s1 = inlined_call_operand.hbm [shape: f32[16,128], index: 1, kind: input, shape index: {}]   ;;  %s917_s2 = inlined_call_operand.hbm [shape: f32[2,8,128], index: 2, kind: output, shape index: {}]  }
   0x1   :  { %9 = vsyncpa [#allocation8 + $0x1], 0 }
   0x2   :  { %10 = vsyncpa [#allocation11], 0 }
   0x3   :  { %12 = vsyncpa [#allocation11 + $0x1], 0 }
   0x4   :  { %13 = vsyncpa [#allocation9], 0 }
   0x5   :  { %15 = vsyncpa [#allocation9 + $0x1], 0  ;;  %s743_s9 = smov 0   ;;  %s745_s10 = smov 0  }
   0x6   :  { %s747_s11 = smov 0   ;;  %s749_s12 = smov 0  }
   0x7   :  { %s751_s13 = smov 0   ;;  %s753_s14 = smov 0  }
   0x8 LB: > { %s481_s15 = sadd.s32 4294967295, %s722_s14   ;;  %s482_s16 = sadd.s32 4294967294, %s722_s14   ;;  %s722_s14 = sphi %s753_s14, %s21_s14   ;;  %s718_s13 = sphi %s751_s13, %s929_s13   ;;  %s714_s12 = sphi %s749_s12, %s928_s12   ;;  %s710_s11 = sphi %s747_s11, %s927_s11   ;;  %s706_s10 = sphi %s745_s10, %s926_s10   ;;  %s702_s9 = sphi %s743_s9, %s925_s9  }
   0x9   : > { %s33_s17 = sadd.s32 1, %s718_s13  ;;  %s42_s18 = sadd.s32 1, %s710_s11 }
   0xa   : > { %p35_p0 = scmp.ge.s32.totalorder %s33_s17, 2  ;;  %p49_p1 = scmp.ne.s32.totalorder %s710_s11, %s706_s10 }
   0xb   : > { %p50_p2 = scmp.eq.s32.totalorder %s722_s14, 0  ;;  %p55_p3 = scmp.ne.s32.totalorder %s706_s10, %s702_s9 }
   0xc   : > { %s931_s17 = smov (%p35_p0, %s33_s17), 0  ;;  %p56_p5 = scmp.eq.s32.totalorder %s481_s15, 0 }
   0xd   : > { %p784_p4 = por %p50_p2, %p49_p1  ;;  %s39_s20 = ssub.s32 %s718_s13, %s931_s17 }
   0xe   : > { %p107_p6 = scmp.eq.s32.totalorder %s481_s15, 1  ;;  %p40_p7 = scmp.eq.s32.totalorder %s39_s20, 0 }
   0xf   : > { %p790_p8 = por %p56_p5, %p55_p3  ;;  %p113_p10 = scmp.eq.s32.totalorder %s482_s16, 1 }
  0x10   : > { %p794_p9 = por %p107_p6, %p49_p1  ;;  %p525_p13 = scmp.lt.s32.totalorder %s722_s14, 2 }
  0x11   : > { %s799_s23 = scalar_select %p40_p7, %s710_s11, %s42_s18  }
  0x12   : > { %p801_p11 = por %p113_p10, %p55_p3  ;;  %s808_s25 = sand.u32 1, %s710_s11  }
  0x13   : > { %s485_s26 = sshll.u32 %s808_s25, 3  ;;  %s486_s27 = sshll.u32 %s718_s13, 7 }
  0x14   : > { %s143_s30 = scalar_lea.hbm %s915_s0, %s486_s27  ;;  %s137_s3 = scalar_lea.vmem [#allocation7], %s485_s26 }
  0x15   : > { %s145_s4 = sshll.u32 %s137_s3, 4  ;;  %p817_p0 = pnand %p525_p13, %p784_p4  ;;  %s146_s4 = int_to_ptr.vmem [resolvable:$true] %s145_s4 }
  0x16   : > { %p489_p1 = scmp.ge.s32.totalorder %s722_s14, 1  ;;  %p169_p2 = scmp.lt.s32.totalorder %s722_s14, 3 }
  0x17   : > { %s134_s6 = scalar_lea.sflag [#allocation8], %s808_s25  ;;  %p584_p3 = pneg %p817_p0 }
  0x18   : > { %s595_s7 = scalar_lea.vmem %s146_s4, 128  ;;  %s724_s8 = smov [#allocation7]  }
  0x19   : > { %p596_p5 = scmp.ne.s32.totalorder %s146_s4, %s595_s7  ;;  %s600_s15 = sshll.u32 %s724_s8, 4  ;;  %s601_s15 = int_to_ptr.vmem [resolvable:$false] %s600_s15 }
  0x1a   : > { %s602_s16 = scalar_lea.vmem %s601_s15, 256  ;;  %p603_p4 = scmp.lt.s32.totalorder %s146_s4, %s601_s15 }
  0x1b   : > { %p598_p6 = pnand %p596_p5, %p584_p3  ;;  %p604_p10 = scmp.lt.s32.totalorder %s602_s16, %s595_s7 }
  0x1d   : > { %p599_p7 = pneg %p598_p6  ;;  %p605_p13 = por %p604_p10, %p603_p4 }
  0x1f   : > { %p606_p12 = pnand %p605_p13, %p599_p7 }
  0x21   : > { %609 = shalt.err (!%p606_p12)
}
  0x22   : > { %517 = dma.hbm_to_vmem [thread:$0]  (!%p817_p0), %s143_s30, 128, %s146_s4, %s134_s6  }
  0x23   : > { %p835_p5 = pnand %p489_p1, %p169_p2  ;;  %s162_s28 = scalar_lea.hbm %s916_s1, %s486_s27 }
  0x24   : > { %s156_s29 = scalar_lea.vmem [#allocation10], %s485_s26  ;;  %s153_s7 = scalar_lea.sflag [#allocation11], %s808_s25 }
  0x25   : > { %s164_s3 = sshll.u32 %s156_s29, 4  ;;  %s725_s30 = smov [#allocation10]   ;;  %s165_s3 = int_to_ptr.vmem [resolvable:$true] %s164_s3 }
  0x26   : > { %s623_s8 = scalar_lea.vmem %s165_s3, 128  ;;  %s628_s4 = sshll.u32 %s725_s30, 4  ;;  %s629_s4 = int_to_ptr.vmem [resolvable:$false] %s628_s4 }
  0x27   : > { %p624_p12 = scmp.ne.s32.totalorder %s165_s3, %s623_s8  ;;  %s630_s6 = scalar_lea.vmem %s629_s4, 256 }
  0x28   : > { %p631_p1 = scmp.lt.s32.totalorder %s165_s3, %s629_s4  ;;  %p632_p2 = scmp.lt.s32.totalorder %s630_s6, %s623_s8 }
  0x29   : > { %p626_p6 = pnand %p624_p12, %p584_p3 }
  0x2a   : > { %p633_p4 = por %p632_p2, %p631_p1 }
  0x2b   : > { %p627_p7 = pneg %p626_p6 }
  0x2d   : > { %p634_p10 = pnand %p633_p4, %p627_p7 }
  0x2f   : > { %637 = shalt.err (!%p634_p10)
}
  0x30   : > { %520 = dma.hbm_to_vmem [thread:$0]  (!%p817_p0), %s162_s28, 128, %s165_s3, %s153_s7  }
  0x31   : > { %173 = sbr.rel (%p835_p5) target bundleno = 441 (0x1b9), region = 28  ;;  %s851_s25 = sand.u32 (!%p835_p5), 1, %s706_s10  }
  0x32   : > { %s854_s26 = sshll.u32 (!%p835_p5), %s851_s25, 3  ;;  %s176_s27 = scalar_lea.sflag (!%p835_p5), [#allocation8], %s851_s25 }
  0x33   : > { %s179_s15 = scalar_lea.vmem (!%p835_p5), [#allocation7], %s854_s26 }
  0x36   : > { %689 = dma.done.wait (%p790_p8), %s176_s27, 128  }
  0x37   : > { %691 = vsyncadd (%p790_p8), %s176_s27, 4294967168  ;;  %s185_s5 = scalar_lea.sflag [#allocation11], %s851_s25  ;;  %s188_s16 = scalar_lea.vmem [#allocation10], %s854_s26 }
  0x38   : > { %693 = dma.done.wait (%p790_p8), %s185_s5, 128  }
  0x39   : > { %695 = vsyncadd (%p790_p8), %s185_s5, 4294967168  ;;  %v225_v0 = vld [vmem:[%s179_s15] sm:$0xff]  ;;  %v226_v7 = vld [vmem:[%s188_s16] sm:$0xff]  ;;  %v726_v14 = vmov 0.0   ;;  %v333_v61 = vlaneseq  ;;  %s213_s29 = scalar_lea.vmem [#allocation12], %s854_s26  ;;  %s495_s7 = sshll.u32 %s714_s12, 7 }
  0x3a   : > { %v227_v1 = vand.u32 2147483647, %v225_v0  ;;  %vm240_vm0 = vcmp.ge.f32.partialorder %v225_v0, 0.0  ;;  %vm249_vm1 = vcmp.gt.f32.partialorder %v226_v7, 0.5  ;;  %v245_v10 = vmax.f32 %v225_v0, 0.0  ;;  %s378_s3 = sshll.u32 %s213_s29, 4  ;;  %s376_s4 = scalar_lea.hbm %s917_s2, %s495_s7  ;;  %s870_s3 = int_to_ptr.vmem [resolvable:$true] %s378_s3 }
  0x3b   : > { %v246_v11 = vmul.f32 %v226_v7, %v225_v0  ;;  %v493_v15 = vsel %vm249_vm1, 1.0, %v726_v14  ;;  %v253_v24 = vmul.f32 %v226_v7, %v226_v7  ;;  %vm335_vm3 = vcmp.lt.s32.totalorder %v333_v61, 1  ;;  %s365_s6 = scalar_lea.sflag [#allocation9], %s851_s25  ;;  %s638_s27 = scalar_lea.vmem %s870_s3, 128 }
  0x3c   : > { %v228_v2 = vsub.f32 0.0, %v227_v1  ;;  %vm338_vm4 = vcmp.lt.s32.totalorder %v333_v61, 2  ;;  %vm341_vm5 = vcmp.lt.s32.totalorder %v333_v61, 3  ;;  %v357_v0 = vshrl.u32 %v333_v61, 7  ;;  %p639_p8 = scmp.ne.s32.totalorder %s870_s3, %s638_s27  ;;  %s727_s26 = smov [#allocation12]  }
  0x3d   : > { %v247_v19 = vsub.f32 %v245_v10, %v246_v11  ;;  %vm344_vm6 = vcmp.lt.s32.totalorder %v333_v61, 4  ;;  %vm347_vm7 = vcmp.lt.s32.totalorder %v333_v61, 5  ;;  %vm350_vm8 = vcmp.lt.s32.totalorder %v333_v61, 6  ;;  %s642_s15 = sshll.u32 %s727_s26, 4  ;;  %s643_s15 = int_to_ptr.vmem [resolvable:$false] %s642_s15 }
  0x3e   : > { %v229_v3 = vmul.f32 1.442695, %v228_v2  ;;  %vm353_vm9 = vcmp.lt.s32.totalorder %v333_v61, 7  ;;  %p640_p0 = pnand %p639_p8, %p794_p9  ;;  %s644_s12 = scalar_lea.vmem %s643_s15, 256 }
  0x3f   : > { %p645_p13 = scmp.lt.s32.totalorder %s870_s3, %s643_s15  ;;  %p646_p5 = scmp.lt.s32.totalorder %s644_s12, %s638_s27 }
  0x40   : > { %576 = vpow2.f32 %v229_v3  ;;  %p641_p3 = pneg %p640_p0 }
  0x41   : > { %p647_p12 = por %p646_p5, %p645_p13 }
  0x43   : > { %p648_p6 = pnand %p647_p12, %p641_p3 }
  0x4d   : > { %v577_v4 = vpop.eup %576 }
  0x4e   : > { %v231_v5 = vadd.f32 1.0, %v577_v4  ;;  %v234_v6 = vmul.f32 -0.5, %v577_v4  ;;  %v237_v9 = vand.u32 2147483647, %v577_v4  ;;  %v241_v12 = vsel %vm240_vm0, 1.0, %v577_v4 }
  0x50   : > { %578 = vrcp.f32 %v231_v5  ;;  %v235_v8 = vadd.f32 1.0, %v234_v6  ;;  %vm238_vm2 = vcmp.lt.f32.partialorder %v237_v9, 0.0004427343 }
  0x51   : > { %580 = vlog2.f32 %v231_v5 }
  0x52   : > { %v236_v16 = vmul.f32 %v577_v4, %v235_v8  ;;  %v358_v8 = vsub.s32 0, %v357_v0 }
  0x5d   : > { %v579_v13 = vpop.eup %578 }
  0x5e   : > { %v581_v17 = vpop.eup %580  ;;  %v244_v18 = vmul.f32 %v579_v13, %v241_v12 }
  0x5f   : > { %v233_v20 = vmul.f32 0.6931472, %v581_v17 }
  0x60   : > { %v259_v21 = vmul.f32 %v493_v15, %v244_v18  ;;  %v252_v22 = vmul.f32 %v244_v18, %v244_v18 }
  0x61   : > { %v239_v23 = vsel %vm238_vm2, %v236_v16, %v233_v20 }
  0x62   : > { %289 = vadd.xlane.f32.xlu0 %v259_v21  ;;  %299 = vadd.xlane.f32.xlu1 %v252_v22  ;;  %v248_v25 = vadd.f32 %v247_v19, %v239_v23 }
  0x66   : > { %309 = vadd.xlane.f32.xlu1 %v253_v24  ;;  %279 = vadd.xlane.f32.xlu0 %v248_v25 }
  0x6a   : > { %319 = vadd.xlane.f32.xlu0 %v493_v15 }
  0xeb   : > { %v290_v26 = vpop.xlane.xlu0 %289  ;;  %v300_v27 = vpop.xlane.xlu1 %299 }
  0xec   : > { %v291_v28 = vrot.slane %v290_v26, 4  ;;  %v301_v29 = vrot.slane %v300_v27, 4 }
  0xee   : > { %v292_v30 = vadd.f32 %v291_v28, %v290_v26  ;;  %v302_v31 = vadd.f32 %v301_v29, %v300_v27 }
  0xef   : > { %v310_v32 = vpop.xlane.xlu1 %309  ;;  %v280_v33 = vpop.xlane.xlu0 %279 }
  0xf0   : > { %v293_v34 = vrot.slane %v292_v30, 2  ;;  %v303_v35 = vrot.slane %v302_v31, 2  ;;  %v311_v36 = vrot.slane %v310_v32, 4  ;;  %v281_v37 = vrot.slane %v280_v33, 4 }
  0xf2   : > { %v312_v38 = vadd.f32 %v311_v36, %v310_v32  ;;  %v282_v39 = vadd.f32 %v281_v37, %v280_v33  ;;  %v294_v41 = vadd.f32 %v293_v34, %v292_v30  ;;  %v304_v45 = vadd.f32 %v303_v35, %v302_v31 }
  0xf3   : > { %v320_v40 = vpop.xlane.xlu0 %319 }
  0xf4   : > { %v313_v42 = vrot.slane %v312_v38, 2  ;;  %v283_v43 = vrot.slane %v282_v39, 2  ;;  %v321_v44 = vrot.slane %v320_v40, 4  ;;  %v295_v49 = vrot.slane %v294_v41, 1 }
  0xf5   : > { %v305_v52 = vrot.slane %v304_v45, 1 }
  0xf6   : > { %v322_v46 = vadd.f32 %v321_v44, %v320_v40  ;;  %v284_v47 = vadd.f32 %v283_v43, %v282_v39  ;;  %v314_v48 = vadd.f32 %v313_v42, %v312_v38  ;;  %v296_v56 = vadd.f32 %v295_v49, %v294_v41 }
  0xf7   : > { %v306_v58 = vadd.f32 %v305_v52, %v304_v45 }
  0xf8   : > { %v323_v50 = vrot.slane %v322_v46, 2  ;;  %v285_v51 = vrot.slane %v284_v47, 1  ;;  %v315_v53 = vrot.slane %v314_v48, 1 }
  0xfa   : > { %v324_v54 = vadd.f32 %v323_v50, %v322_v46  ;;  %v286_v55 = vadd.f32 %v285_v51, %v284_v47  ;;  %v316_v57 = vadd.f32 %v315_v53, %v314_v48 }
  0xfc   : > { %498 = vpush %v286_v55  ;;  %v325_v59 = vrot.slane %v324_v54, 1 }
  0xfd   : > { %500 = vpush %v296_v56 }
  0xfe   : > { %502 = vpush %v306_v58  ;;  %v326_v60 = vadd.f32 %v325_v59, %v324_v54 }
  0xff   : > { %504 = vpush %v316_v57 }
 0x100   : > { %506 = vpush %v326_v60 }
 0x12d   : > { %s499_s21 = spop %498 }
 0x12e   : > { %v328_v62 = vstv %s499_s21  ;;  %s501_s18 = spop %500 }
 0x12f   : > { %v329_v63 = vstv %s501_s18  ;;  %s503_s19 = spop %502 }
 0x130   : > { %v337_v1 = vsel %vm335_vm3, %v328_v62, %v329_v63  ;;  %v330_v2 = vstv %s503_s19  ;;  %s505_s20 = spop %504 }
 0x131   : > { %v340_v3 = vsel %vm338_vm4, %v337_v1, %v330_v2  ;;  %v331_v4 = vstv %s505_s20  ;;  %s507_s28 = spop %506 }
 0x132   : > { %v343_v5 = vsel %vm341_vm5, %v340_v3, %v331_v4  ;;  %v332_v6 = vstv %s507_s28 }
 0x133   : > { %v346_v7 = vsel %vm344_vm6, %v343_v5, %v332_v6 }
 0x134   : > { %v349_v9 = vsel %vm347_vm7, %v346_v7, 0.0 }
 0x135   : > { %v352_v10 = vsel %vm350_vm8, %v349_v9, 0.0 }
 0x136   : > { %v355_v11 = vsel %vm353_vm9, %v352_v10, 0.0 }
 0x137   : > { %v359_v12 = vrot.slane %v355_v11, %v358_v8 }
 0x139   : > { %361 = vbcast.lane.b32.xlu1 %v359_v12, 256 }
 0x1ab   : > { %v362_v13 = vpop.permute.xlu1 %361 }
 0x1ac   : > { %363 = vst [vmem:[%s213_s29] sm:$0xff] %v362_v13 }
 0x1ad   : > { %651 = shalt.err (!%p648_p6)
}
 0x1ae   : > { %s652_s5 = scalar_lea.hbm %s376_s4, 128  ;;  %s656_s21 = scalar_lea.hbm %s917_s2, 256 }
 0x1af   : > { %p653_p7 = scmp.ne.s32.totalorder %s376_s4, %s652_s5  ;;  %p657_p4 = scmp.lt.s32.totalorder %s376_s4, %s917_s2 }
 0x1b0   : > { %p658_p10 = scmp.lt.s32.totalorder %s656_s21, %s652_s5 }
 0x1b1   : > { %p654_p1 = pnand %p653_p7, %p794_p9 }
 0x1b2   : > { %p659_p8 = por %p658_p10, %p657_p4 }
 0x1b3   : > { %p655_p2 = pneg %p654_p1 }
 0x1b5   : > { %p660_p0 = pnand %p659_p8, %p655_p2 }
 0x1b7   : > { %663 = shalt.err (!%p660_p0)
}
 0x1b8   : > { %512 = dma.vmem_to_hbm [thread:$0]  (%p794_p9), %s870_s3, 128, %s376_s4, %s365_s6  }
 0x1b9 PF: > { %s390_s20 = sand.u32 1, %s702_s9   ;;  %p924_p3 = scmp.ge.s32.totalorder %s722_s14, 2 }
 0x1ba   : > { %s391_s28 = scalar_lea.sflag [#allocation9], %s390_s20 }
 0x1bb   : > { %p522_p13 = pnand %p924_p3, %p801_p11 }
 0x1bd   : > { %p523_p5 = pneg %p522_p13 }
 0x1bf   : > { %697 = dma.done.wait (%p523_p5), %s391_s28, 128  }
 0x1c0   : > { %699 = vsyncadd (%p523_p5), %s391_s28, 4294967168  ;;  %s21_s14 = sadd.s32 1, %s722_s14   ;;  %s925_s9 = smov %s706_s10 }
 0x1c1   : > { %p18_p12 = scmp.ge.s32.totalorder %s21_s14, 4   ;;  %s926_s10 = smov %s710_s11 }
 0x1c2   : > { %s927_s11 = smov %s799_s23  ;;  %s928_s12 = smov %s718_s13 }
 0x1c3   : > { %s929_s13 = smov %s931_s17  ;;  %20 = sbr.rel (!%p18_p12) target bundleno = 8 (0x8), region = 94 }
 0x1c8   :  { %396 = vsyncpa [#allocation8], 1 }
 0x1c9   :  { %398 = vsyncpa [#allocation8 + $0x1], 1 }
 0x1ca   :  { %399 = vsyncpa [#allocation11], 1 }
 0x1cb   :  { %401 = vsyncpa [#allocation11 + $0x1], 1 }
 0x1cc   :  { %402 = vsyncpa [#allocation9], 1 }
 0x1cd   :  { %404 = vsyncpa [#allocation9 + $0x1], 1 }

</bundles_post_ra>
